<compile_context>
chip_gen: v7x
topology: tpu7x:2x2x1
jax: 0.10.0
libtpu: 0.0.40
codegen_flags: <defaults>
</compile_context>

<pallas_src>
import functools

import jax
import jax.numpy as jnp
import numpy as np
from jax.experimental import pallas as pl
from jax.experimental.pallas import tpu as pltpu

EPS = 1e-5
_LANE = 128
_MIB = 1024 * 1024


# --------------------------------------------------------------------------
# Hardware query / VMEM planning
# --------------------------------------------------------------------------
def _round_up(x, m):
    return ((x + m - 1) // m) * m


@functools.lru_cache(maxsize=None)
def _hw_info():
    """Returns (per-core VMEM capacity in bytes, assume-two-TensorCores)."""
    cap = None
    try:
        info = pltpu.get_tpu_info()
        cap = int(getattr(info, "vmem_capacity_bytes", 0)) or None
    except Exception:
        cap = None
    if cap is None:
        cap = 64 * _MIB  # conservative default == v7x per-TC VMEM
    # v7x is the only generation with <128 MiB per-TC VMEM and 2 TCs per chip.
    return cap, cap < 100 * _MIB


def _default_budget(cap):
    # Generation-specific block(+temporaries) budget.  The kernel is purely
    # HBM bound, so bigger blocks -> fewer grid steps -> longer DMA bursts,
    # but we keep headroom below physical VMEM for double-buffering and
    # compiler scratch (64 MiB/TC on v7x vs 128 MiB on v5e/v6e).
    if cap >= 128 * _MIB:
        return 80 * _MIB  # v5e / v6e
    return 36 * _MIB      # v7x


def _slab_bytes(bb, t, c, dtype):
    """VMEM bytes of one (bb, t, c) slab after (sublane, lane) tile padding."""
    itemsize = jnp.dtype(dtype).itemsize
    sub = max(8, 32 // itemsize)  # f32 -> 8, bf16 -> 16, int8 -> 32 sublanes
    return bb * _round_up(t, sub) * _round_up(max(c, 1), _LANE) * itemsize


def _norm_fused_bytes(bb, T, ct, dtype):
    """Single-pass norm: x in + y out (double-buffered), packed stats out,
    weight/bias blocks, plus in-kernel f32 temporaries."""
    return (4 * _slab_bytes(bb, T, ct, dtype)            # x + y, double-buffered
            + 2 * _slab_bytes(bb, 2, ct, jnp.float32)    # packed stats out
            + 4 * _slab_bytes(1, 1, ct, jnp.float32)     # weight / bias
            + 2 * _slab_bytes(bb, T, ct, jnp.float32)    # f32 x copy + intermediate
            + 8 * _slab_bytes(bb, 1, ct, jnp.float32))   # mean/std/scale/shift


def _stats_pass_bytes(bb, tt, ct, dtype):
    """Fallback pass 1: x in (double-buffered), resident packed-stats block,
    f32 temporaries for the partial sums."""
    return (2 * _slab_bytes(bb, tt, ct, dtype)
            + 2 * _slab_bytes(bb, 2, ct, jnp.float32)
            + 2 * _slab_bytes(bb, tt, ct, jnp.float32)
            + 6 * _slab_bytes(bb, 1, ct, jnp.float32))


def _elem_pass_bytes(bb, tt, ct, dtype):
    """Elementwise affine pass (norm-apply / denorm)."""
    return (4 * _slab_bytes(bb, tt, ct, dtype)           # x + y, double-buffered
            + 4 * _slab_bytes(bb, 2, ct, jnp.float32)    # stats / mean / std
            + 4 * _slab_bytes(1, 1, ct, jnp.float32)     # weight / bias
            + 2 * _slab_bytes(bb, tt, ct, jnp.float32)   # f32 temporaries
            + 8 * _slab_bytes(bb, 1, ct, jnp.float32))


def _choose_ct(C, budget, foot):
    """Full C unless C is 128-divisible and even a single-batch slab is too big."""
    if C % _LANE != 0 or foot(C) <= budget:
        return C
    cands = [c for c in range(_LANE, C, _LANE) if C % c == 0]
    fitting = [c for c in cands if foot(c) <= budget]
    if fitting:
        return max(fitting)
    return min(cands) if cands else C


def _choose_tt(T, fits):
    """Largest power-of-two T tile (>=8 sublanes) that fits the budget."""
    tt = 256
    while tt * 2 < T and fits(tt * 2):
        tt *= 2
    while tt > 8 and not fits(tt):
        tt //= 2
    return min(tt, T)


def _choose_bb(B, other_steps, two_tc, fits):
    divisors = [d for d in range(1, B + 1) if B % d == 0 and fits(d)]
    if not divisors:
        return 1
    if two_tc:
        # Prefer an even total parallel step count so both v7x TensorCores do
        # the same amount of HBM traffic (odd counts leave one core idle for
        # part of the kernel).
        even = [d for d in divisors if ((B // d) * other_steps) % 2 == 0]
        if even:
            return max(even)
    return max(divisors)


def _vmem_limit(est_bytes, cap):
    return int(min(cap - 4 * _MIB, max(32 * _MIB, est_bytes + 8 * _MIB)))


def _plan_norm(B, T, C, dtype, budget_override=None):
    cap, two_tc = _hw_info()
    budget = budget_override or _default_budget(cap)

    ct = _choose_ct(C, budget, lambda c: _norm_fused_bytes(1, T, c, dtype))
    c_steps = C // ct

    if _norm_fused_bytes(1, T, ct, dtype) <= budget:
        bb = _choose_bb(B, c_steps, two_tc,
                        lambda d: _norm_fused_bytes(d, T, ct, dtype) <= budget)
        est = _norm_fused_bytes(bb, T, ct, dtype)
        return dict(fused=True, bb=bb, ct=ct, tt=T,
                    vmem_limit=_vmem_limit(est, cap))

    # Even a single-batch full-T slab is too big: tile T (two passes over x).
    def foot(bb, tt):
        return max(_stats_pass_bytes(bb, tt, ct, dtype),
                   _elem_pass_bytes(bb, tt, ct, dtype))

    tt = _choose_tt(T, lambda t: foot(1, t) <= budget)
    bb = _choose_bb(B, c_steps, two_tc, lambda d: foot(d, tt) <= budget)
    est = foot(bb, tt)
    return dict(fused=False, bb=bb, ct=ct, tt=tt,
                vmem_limit=_vmem_limit(est, cap))


def _plan_elem(B, T, C, dtype, budget_override=None):
    cap, two_tc = _hw_info()
    budget = budget_override or _default_budget(cap)

    ct = _choose_ct(C, budget, lambda c: _elem_pass_bytes(1, T, c, dtype))
    c_steps = C // ct
    if _elem_pass_bytes(1, T, ct, dtype) <= budget:
        tt = T
    else:
        tt = _choose_tt(T, lambda t: _elem_pass_bytes(1, t, ct, dtype) <= budget)
    t_steps = pl.cdiv(T, tt)
    bb = _choose_bb(B, c_steps * t_steps, two_tc,
                    lambda d: _elem_pass_bytes(d, tt, ct, dtype) <= budget)
    est = _elem_pass_bytes(bb, tt, ct, dtype)
    return dict(bb=bb, ct=ct, tt=tt, vmem_limit=_vmem_limit(est, cap))


# --------------------------------------------------------------------------
# Kernels
# --------------------------------------------------------------------------
def _norm_fused_kernel(x_ref, w_ref, b_ref, y_ref, stats_ref):
    # x_ref: (Bb, T, Ct); w/b: (1, Ct); y: (Bb, T, Ct); stats: (Bb, 2, Ct) f32.
    x = x_ref[...].astype(jnp.float32)
    t = x.shape[1]
    mean = jnp.mean(x, axis=1, keepdims=True)                    # (Bb, 1, Ct)
    # torch.std default is unbiased (correction=1).
    # TODO(synk): T == 1 gives std = EPS here; torch.std returns NaN there.
    var = jnp.sum(jnp.square(x - mean), axis=1, keepdims=True) * (1.0 / max(t - 1, 1))
    std = jnp.sqrt(var) + EPS
    w = w_ref[...][None].astype(jnp.float32)                     # (1, 1, Ct)
    b = b_ref[...][None].astype(jnp.float32)
    # Fold (/std)*weight into one per-(b,c) scale + shift: the big (T, Ct)
    # slab sees a single multiply-add per element and no `diff` slab is kept
    # live for the store (x is re-read instead).
    scale = w * pl.reciprocal(std, approx=False)
    shift = b - mean * scale
    y_ref[...] = (x * scale + shift).astype(y_ref.dtype)
    # Single packed-stats store (row 0 = mean, row 1 = std).
    sel = jax.lax.broadcasted_iota(jnp.int32, stats_ref.shape, 1) == 0
    stats_ref[...] = jnp.where(sel, mean, std)


def _stats_accum_kernel(x_ref, stats_ref, *, t_total, tt):
    # Fallback pass 1: accumulate sum / sum-of-squares over the T grid axis
    # (arbitrary) into the resident packed-stats block; finalize on last step.
    ti = pl.program_id(2)
    sel = jax.lax.broadcasted_iota(jnp.int32, stats_ref.shape, 1) == 0

    @pl.when(ti == 0)
    def _():
        stats_ref[...] = jnp.zeros_like(stats_ref)

    x = x_ref[...].astype(jnp.float32)                           # (Bb, tt, Ct)
    row = jax.lax.broadcasted_iota(jnp.int32, x.shape, 1) + ti * tt
    x = jnp.where(row < t_total, x, 0.0)   # mask a possibly-partial tail block
    s = jnp.sum(x, axis=1, keepdims=True)
    sq = jnp.sum(x * x, axis=1, keepdims=True)
    stats_ref[...] += jnp.where(sel, s, sq)

    @pl.when(ti == pl.num_programs(2) - 1)
    def _():
        n = jnp.float32(t_total)
        mean = stats_ref[:, 0:1, :] / n
        var = jnp.maximum(stats_ref[:, 1:2, :] - n * mean * mean, 0.0)
        std = jnp.sqrt(var * (1.0 / max(t_total - 1, 1))) + EPS
        stats_ref[...] = jnp.where(sel, mean, std)


def _norm_apply_kernel(x_ref, w_ref, b_ref, stats_ref, y_ref):
    # Fallback pass 2: y = (x - mean)/std*w + b  ==  x*scale + shift.
    x = x_ref[...].astype(jnp.float32)
    mean = stats_ref[:, 0:1, :]
    std = stats_ref[:, 1:2, :]
    w = w_ref[...][None].astype(jnp.float32)
    b = b_ref[...][None].astype(jnp.float32)
    scale = w * pl.reciprocal(std, approx=False)
    shift = b - mean * scale
    y_ref[...] = (x * scale + shift).astype(y_ref.dtype)


def _denorm_kernel(x_ref, w_ref, b_ref, mean_ref, std_ref, y_ref):
    # y = (x - b)/w * std + mean  ==  x*(std/w) + (mean - b*std/w).
    x = x_ref[...].astype(jnp.float32)
    mean = mean_ref[...].astype(jnp.float32)                     # (Bb, 1, Ct)
    std = std_ref[...].astype(jnp.float32)
    w = w_ref[...][None].astype(jnp.float32)
    b = b_ref[...][None].astype(jnp.float32)
    scale = std * pl.reciprocal(w, approx=False)
    shift = mean - b * scale
    y_ref[...] = (x * scale + shift).astype(y_ref.dtype)


# --------------------------------------------------------------------------
# Wrappers
# --------------------------------------------------------------------------
def revin_norm(x, weight, bias, *, block_budget_bytes=None):
    """x: (B, T, C); weight/bias: (C,). Returns (y, mean, std); stats (B,1,C) f32."""
    B, T, C = x.shape
    plan = _plan_norm(B, T, C, x.dtype, block_budget_bytes)
    bb, ct, tt = plan["bb"], plan["ct"], plan["tt"]
    c_steps, b_steps = C // ct, B // bb
    w2 = weight.reshape(1, C)
    b2 = bias.reshape(1, C)

    if plan["fused"]:
        y, stats = pl.pallas_call(
            _norm_fused_kernel,
            out_shape=(jax.ShapeDtypeStruct((B, T, C), x.dtype),
                       jax.ShapeDtypeStruct((B, 2, C), jnp.float32)),
            grid_spec=pltpu.PrefetchScalarGridSpec(
                num_scalar_prefetch=0,
                # C-tiles outermost so the tiny (1, ct) weight/bias blocks keep
                # the same block index across the inner batch loop (no re-DMA).
                grid=(c_steps, b_steps),
                in_specs=[
                    pl.BlockSpec((bb, T, ct), lambda jc, ib: (ib, 0, jc)),
                    pl.BlockSpec((1, ct), lambda jc, ib: (0, jc)),
                    pl.BlockSpec((1, ct), lambda jc, ib: (0, jc)),
                ],
                out_specs=[
                    pl.BlockSpec((bb, T, ct), lambda jc, ib: (ib, 0, jc)),
                    pl.BlockSpec((bb, 2, ct), lambda jc, ib: (ib, 0, jc)),
                ],
            ),
            compiler_params=pltpu.CompilerParams(
                dimension_semantics=("parallel", "parallel"),
                vmem_limit_bytes=plan["vmem_limit"]),
        )(x, w2, b2)
    else:
        # T-tiled fallback: one stats-accumulation pass plus one elementwise
        # apply pass (extra read of x, used only when a whole-T block cannot
        # fit the VMEM budget).
        t_steps = pl.cdiv(T, tt)
        stats = pl.pallas_call(
            functools.partial(_stats_accum_kernel, t_total=T, tt=tt),
            out_shape=jax.ShapeDtypeStruct((B, 2, C), jnp.float32),
            grid_spec=pltpu.PrefetchScalarGridSpec(
                num_scalar_prefetch=0,
                grid=(c_steps, b_steps, t_steps),
                in_specs=[pl.BlockSpec((bb, tt, ct), lambda jc, ib, kt: (ib, kt, jc))],
                out_specs=pl.BlockSpec((bb, 2, ct), lambda jc, ib, kt: (ib, 0, jc)),
            ),
            compiler_params=pltpu.CompilerParams(
                dimension_semantics=("parallel", "parallel", "arbitrary"),
                vmem_limit_bytes=plan["vmem_limit"]),
        )(x)
        y = pl.pallas_call(
            _norm_apply_kernel,
            out_shape=jax.ShapeDtypeStruct((B, T, C), x.dtype),
            grid_spec=pltpu.PrefetchScalarGridSpec(
                num_scalar_prefetch=0,
                grid=(c_steps, b_steps, t_steps),
                in_specs=[
                    pl.BlockSpec((bb, tt, ct), lambda jc, ib, kt: (ib, kt, jc)),
                    pl.BlockSpec((1, ct), lambda jc, ib, kt: (0, jc)),
                    pl.BlockSpec((1, ct), lambda jc, ib, kt: (0, jc)),
                    pl.BlockSpec((bb, 2, ct), lambda jc, ib, kt: (ib, 0, jc)),
                ],
                out_specs=pl.BlockSpec((bb, tt, ct), lambda jc, ib, kt: (ib, kt, jc)),
            ),
            compiler_params=pltpu.CompilerParams(
                dimension_semantics=("parallel", "parallel", "parallel"),
                vmem_limit_bytes=plan["vmem_limit"]),
        )(x, w2, b2, stats)

    return y, stats[:, 0:1, :], stats[:, 1:2, :]


def revin_denorm(x, weight, bias, mean, std, *, block_budget_bytes=None):
    """Inverse transform using stats produced by revin_norm."""
    B, T, C = x.shape
    plan = _plan_elem(B, T, C, x.dtype, block_budget_bytes)
    bb, ct, tt = plan["bb"], plan["ct"], plan["tt"]
    c_steps, b_steps, t_steps = C // ct, B // bb, pl.cdiv(T, tt)
    w2 = weight.reshape(1, C)
    b2 = bias.reshape(1, C)
    mean3 = mean.reshape(B, 1, C).astype(jnp.float32)
    std3 = std.reshape(B, 1, C).astype(jnp.float32)
    return pl.pallas_call(
        _denorm_kernel,
        out_shape=jax.ShapeDtypeStruct((B, T, C), x.dtype),
        grid_spec=pltpu.PrefetchScalarGridSpec(
            num_scalar_prefetch=0,
            grid=(c_steps, b_steps, t_steps),
            in_specs=[
                pl.BlockSpec((bb, tt, ct), lambda jc, ib, kt: (ib, kt, jc)),
                pl.BlockSpec((1, ct), lambda jc, ib, kt: (0, jc)),
                pl.BlockSpec((1, ct), lambda jc, ib, kt: (0, jc)),
                pl.BlockSpec((bb, 1, ct), lambda jc, ib, kt: (ib, 0, jc)),
                pl.BlockSpec((bb, 1, ct), lambda jc, ib, kt: (ib, 0, jc)),
            ],
            out_specs=pl.BlockSpec((bb, tt, ct), lambda jc, ib, kt: (ib, kt, jc)),
        ),
        compiler_params=pltpu.CompilerParams(
            dimension_semantics=("parallel", "parallel", "parallel"),
            vmem_limit_bytes=plan["vmem_limit"]),
    )(x, w2, b2, mean3, std3)


# --------------------------------------------------------------------------
# Reference + demo
# --------------------------------------------------------------------------
def _reference_norm(x, weight, bias):
    mean = jnp.mean(x, axis=1, keepdims=True)
    std = jnp.std(x, axis=1, keepdims=True, ddof=1) + EPS
    return (x - mean) / std * weight + bias, mean, std


if __name__ == "__main__":
    B, T, C = 2, 16, 8  # batch, seq_len, num_features
    key = jax.random.PRNGKey(0)
    kx, kw, kb = jax.random.split(key, 3)
    x = jax.random.normal(kx, (B, T, C), dtype=jnp.float32) * 2.0 + 0.5
    # Module __init__ uses ones/zeros; perturb deterministically so the affine
    # path is exercised non-trivially.
    weight = jnp.ones((C,), jnp.float32) + 0.1 * jax.random.normal(kw, (C,), jnp.float32)
    bias = jnp.zeros((C,), jnp.float32) + 0.05 * jax.random.normal(kb, (C,), jnp.float32)

    y_ref, mean_ref, std_ref = _reference_norm(x, weight, bias)

    # mode='norm' + mode='denorm' round trip (fused single-block-T path).
    y, mean, std = revin_norm(x, weight, bias)
    x_rec = revin_denorm(y, weight, bias, mean, std)
    jax.block_until_ready((y, mean, std, x_rec))
    assert np.allclose(np.asarray(y), np.asarray(y_ref), rtol=1e-5, atol=1e-5)
    assert np.allclose(np.asarray(mean), np.asarray(mean_ref), rtol=1e-5, atol=1e-5)
    assert np.allclose(np.asarray(std), np.asarray(std_ref), rtol=1e-5, atol=1e-5)
    assert np.allclose(np.asarray(x_rec), np.asarray(x), rtol=1e-4, atol=1e-4)

    # Exercise the T-tiled fallback (stats-accumulation + apply passes, and
    # T-tiled denorm) by forcing a tiny block budget; semantics must match.
    y2, mean2, std2 = revin_norm(x, weight, bias, block_budget_bytes=100 * 1024)
    x_rec2 = revin_denorm(y2, weight, bias, mean2, std2, block_budget_bytes=100 * 1024)
    jax.block_until_ready((y2, mean2, std2, x_rec2))
    assert np.allclose(np.asarray(y2), np.asarray(y_ref), rtol=1e-4, atol=1e-4)
    assert np.allclose(np.asarray(mean2), np.asarray(mean_ref), rtol=1e-4, atol=1e-4)
    assert np.allclose(np.asarray(std2), np.asarray(std_ref), rtol=1e-4, atol=1e-4)
    assert np.allclose(np.asarray(x_rec2), np.asarray(x), rtol=1e-4, atol=1e-4)

    print("KERNEL_OK")
</pallas_src>

<mosaic_0001>
module attributes {stable_mosaic.version = 11 : i64} {
  func.func @_norm_fused_kernel(%arg0: i32, %arg1: i32, %arg2: memref<1x16x8xf32, #tpu.memory_space<vmem>>, %arg3: memref<1x8xf32, #tpu.memory_space<vmem>>, %arg4: memref<1x8xf32, #tpu.memory_space<vmem>>, %arg5: memref<1x16x8xf32, #tpu.memory_space<vmem>>, %arg6: memref<1x2x8xf32, #tpu.memory_space<vmem>>) attributes {dimension_semantics = [#tpu.dimension_semantics<parallel>, #tpu.dimension_semantics<parallel>], iteration_bounds = array<i64: 1, 2>, scalar_prefetch = 0 : i64, scratch_operands = 0 : i64, tpu.core_type = #tpu.core_type<tc>, window_params = [{transform_indices = @transform_0, window_bounds = array<i64: 1, 16, 8>}, {transform_indices = @transform_1, window_bounds = array<i64: 1, 8>}, {transform_indices = @transform_2, window_bounds = array<i64: 1, 8>}, {transform_indices = @transform_3, window_bounds = array<i64: 1, 16, 8>}, {transform_indices = @transform_4, window_bounds = array<i64: 1, 2, 8>}]} {
    %c0 = arith.constant 0 : index
    %c0_0 = arith.constant 0 : index
    %c0_1 = arith.constant 0 : index
    %0 = vector.load %arg2[%c0, %c0_0, %c0_1] : memref<1x16x8xf32, #tpu.memory_space<vmem>>, vector<1x16x8xf32>
    %cst = arith.constant dense<0.000000e+00> : vector<1x8xf32>
    %1 = vector.multi_reduction <add>, %0, %cst [1] : vector<1x16x8xf32> to vector<1x8xf32>
    %2 = vector.shape_cast %1 : vector<1x8xf32> to vector<1x1x8xf32>
    %cst_2 = arith.constant 1.600000e+01 : f32
    %3 = vector.broadcast %cst_2 : f32 to vector<1x1x8xf32>
    %4 = arith.divf %2, %3 : vector<1x1x8xf32>
    %5 = vector.broadcast %4 : vector<1x1x8xf32> to vector<1x16x8xf32>
    %6 = arith.subf %0, %5 : vector<1x16x8xf32>
    %7 = arith.mulf %6, %6 : vector<1x16x8xf32>
    %cst_3 = arith.constant dense<0.000000e+00> : vector<1x8xf32>
    %8 = vector.multi_reduction <add>, %7, %cst_3 [1] : vector<1x16x8xf32> to vector<1x8xf32>
    %9 = vector.shape_cast %8 : vector<1x8xf32> to vector<1x1x8xf32>
    %cst_4 = arith.constant 0.0666666701 : f32
    %10 = vector.broadcast %cst_4 : f32 to vector<1x1x8xf32>
    %11 = arith.mulf %9, %10 : vector<1x1x8xf32>
    %12 = math.sqrt %11 : vector<1x1x8xf32>
    %cst_5 = arith.constant 9.99999974E-6 : f32
    %13 = vector.broadcast %cst_5 : f32 to vector<1x1x8xf32>
    %14 = arith.addf %12, %13 : vector<1x1x8xf32>
    %c0_6 = arith.constant 0 : index
    %c0_7 = arith.constant 0 : index
    %15 = vector.load %arg3[%c0_6, %c0_7] : memref<1x8xf32, #tpu.memory_space<vmem>>, vector<1x8xf32>
    %16 = vector.shape_cast %15 : vector<1x8xf32> to vector<1x1x8xf32>
    %c0_8 = arith.constant 0 : index
    %c0_9 = arith.constant 0 : index
    %17 = vector.load %arg4[%c0_8, %c0_9] : memref<1x8xf32, #tpu.memory_space<vmem>>, vector<1x8xf32>
    %18 = vector.shape_cast %17 : vector<1x8xf32> to vector<1x1x8xf32>
    %19 = tpu.reciprocal %14 : vector<1x1x8xf32> -> vector<1x1x8xf32>
    %20 = arith.mulf %16, %19 : vector<1x1x8xf32>
    %21 = arith.mulf %4, %20 : vector<1x1x8xf32>
    %22 = arith.subf %18, %21 : vector<1x1x8xf32>
    %23 = vector.broadcast %20 : vector<1x1x8xf32> to vector<1x16x8xf32>
    %24 = arith.mulf %0, %23 : vector<1x16x8xf32>
    %25 = vector.broadcast %22 : vector<1x1x8xf32> to vector<1x16x8xf32>
    %26 = arith.addf %24, %25 : vector<1x16x8xf32>
    %c0_10 = arith.constant 0 : index
    %c0_11 = arith.constant 0 : index
    %c0_12 = arith.constant 0 : index
    %27 = vector.load %arg5[%c0_10, %c0_11, %c0_12] : memref<1x16x8xf32, #tpu.memory_space<vmem>>, vector<1x16x8xf32>
    tpu.vector_store %arg5[%c0_10, %c0_11, %c0_12], %26 {strides = array<i32>} : memref<1x16x8xf32, #tpu.memory_space<vmem>>, vector<1x16x8xf32>,
    %28 = tpu.iota {dimensions = array<i32: 1>} : vector<1x2x8xi32>
    %c0_i32 = arith.constant 0 : i32
    %29 = vector.broadcast %c0_i32 : i32 to vector<1x2x8xi32>
    %30 = arith.cmpi eq, %28, %29 : vector<1x2x8xi32>
    %31 = vector.shape_cast %4 : vector<1x1x8xf32> to vector<1x1x8xf32>
    %32 = vector.broadcast %31 : vector<1x1x8xf32> to vector<1x2x8xf32>
    %33 = vector.shape_cast %14 : vector<1x1x8xf32> to vector<1x1x8xf32>
    %34 = vector.broadcast %33 : vector<1x1x8xf32> to vector<1x2x8xf32>
    %35 = arith.select %30, %32, %34 : vector<1x2x8xi1>, vector<1x2x8xf32>
    %c0_13 = arith.constant 0 : index
    %c0_14 = arith.constant 0 : index
    %c0_15 = arith.constant 0 : index
    %36 = vector.load %arg6[%c0_13, %c0_14, %c0_15] : memref<1x2x8xf32, #tpu.memory_space<vmem>>, vector<1x2x8xf32>
    tpu.vector_store %arg6[%c0_13, %c0_14, %c0_15], %35 {strides = array<i32>} : memref<1x2x8xf32, #tpu.memory_space<vmem>>, vector<1x2x8xf32>,
    return
  }
  func.func @transform_0(%arg0: i32, %arg1: i32) -> (i32, i32, i32) {
    %c0_i32 = arith.constant 0 : i32
    %c0_i32_0 = arith.constant 0 : i32
    return %arg1, %c0_i32, %arg0 : i32, i32, i32
  }
  func.func @transform_1(%arg0: i32, %arg1: i32) -> (i32, i32) {
    %c0_i32 = arith.constant 0 : i32
    %c0_i32_0 = arith.constant 0 : i32
    return %c0_i32, %arg0 : i32, i32
  }
  func.func @transform_2(%arg0: i32, %arg1: i32) -> (i32, i32) {
    %c0_i32 = arith.constant 0 : i32
    %c0_i32_0 = arith.constant 0 : i32
    return %c0_i32, %arg0 : i32, i32
  }
  func.func @transform_3(%arg0: i32, %arg1: i32) -> (i32, i32, i32) {
    %c0_i32 = arith.constant 0 : i32
    %c0_i32_0 = arith.constant 0 : i32
    return %arg1, %c0_i32, %arg0 : i32, i32, i32
  }
  func.func @transform_4(%arg0: i32, %arg1: i32) -> (i32, i32, i32) {
    %c0_i32 = arith.constant 0 : i32
    %c0_i32_0 = arith.constant 0 : i32
    return %arg1, %c0_i32, %arg0 : i32, i32, i32
  }
}

</mosaic_0001>

<bundles_post_ra>
// kernel: tpu_custom_call.1
= control target key start
LH: loop header
LB: loop body
LE: loop exit
PB: predicated region body
PF: predicated region fallthrough
CT: control target
= control target key end

     0   :  { %10 = vsyncpa [#allocation3], 0  ;;  %s829_s0 = inlined_call_operand.vmem [shape: f32[2,16,8], index: 0, kind: input, shape index: {}]   ;;  %s830_s1 = inlined_call_operand.vmem [shape: f32[1,8], index: 1, kind: input, shape index: {}]   ;;  %s831_s2 = inlined_call_operand.vmem [shape: f32[1,8], index: 2, kind: input, shape index: {}]   ;;  %s832_s3 = inlined_call_operand.vmem [shape: f32[2,16,8], index: 3, kind: output, shape index: {0}]   ;;  %s833_s4 = inlined_call_operand.hbm [shape: f32[2,2,8], index: 4, kind: output, shape index: {1}]  }
   0x1   :  { %12 = vsyncpa [#allocation3 + $0x1], 0  ;;  %s679_s15 = smov 0   ;;  %s681_s16 = smov 0  }
   0x2   :  { %s683_s17 = smov 0   ;;  %s685_s18 = smov 0  }
   0x3   :  { %s687_s19 = smov 0   ;;  %s689_s20 = smov 0  }
   0x4 LB: > { %s496_s21 = sadd.s32 4294967295, %s651_s20   ;;  %s497_s22 = sadd.s32 4294967294, %s651_s20   ;;  %s651_s20 = sphi %s689_s20, %s18_s20   ;;  %s647_s19 = sphi %s687_s19, %s840_s19   ;;  %s643_s18 = sphi %s685_s18, %s839_s18   ;;  %s639_s17 = sphi %s683_s17, %s838_s17   ;;  %s635_s16 = sphi %s681_s16, %s837_s16   ;;  %s631_s15 = sphi %s679_s15, %s836_s15  }
   0x5   : > { %s27_s23 = sadd.s32 1, %s647_s19  ;;  %s147_s24 = sadd.s32 1, %s639_s17 }
   0x6   : > { %p28_p0 = scmp.ge.s32.totalorder %s27_s23, 2  ;;  %p157_p1 = scmp.ne.s32.totalorder %s639_s17, %s635_s16 }
   0x7   : > { %p158_p2 = scmp.eq.s32.totalorder %s496_s21, 1  ;;  %p163_p3 = scmp.ne.s32.totalorder %s635_s16, %s631_s15 }
   0x8   : > { %s842_s23 = smov (%p28_p0, %s27_s23), 0  ;;  %p164_p5 = scmp.eq.s32.totalorder %s497_s22, 1 }
   0x9   : > { %p719_p4 = por %p158_p2, %p157_p1  ;;  %s142_s26 = ssub.s32 %s647_s19, %s842_s23 }
   0xa   : > { %p502_p6 = scmp.ge.s32.totalorder %s651_s20, 1  ;;  %p145_p7 = scmp.eq.s32.totalorder %s142_s26, 0 }
   0xb   : > { %p726_p8 = por %p164_p5, %p163_p3  ;;  %p205_p9 = scmp.lt.s32.totalorder %s651_s20, 3 }
   0xc   : > { %s732_s28 = scalar_select %p145_p7, %s639_s17, %s147_s24  }
   0xd   : > { %p206_p10 = pnand %p502_p6, %p205_p9 }
   0xe   : > { %p248_p11 = scmp.lt.s32.totalorder (!%p206_p10), %s643_s18, 1  ;;  %vm272_vm0 = vcmask (!%p206_p10), 64512   ;;  %s245_s8 = sand.u32 (!%p206_p10), 1, %s635_s16   ;;  %v313_v26 = vlaneseq (!%p206_p10)  ;;  %vm334_vm4 = vcmask (!%p206_p10), 58368  }
   0xf   : > { %209 = sbr.rel (%p206_p10) target bundleno = 108 (0x6c), region = 32  ;;  %s503_s9 = sshll.u32 (!%p206_p10), %s245_s8, 1 }
  0x10   : > { %v314_v30 = vshrl.u32 (!%p206_p10), %v313_v26, 7  ;;  %s247_s10 = scalar_lea.vmem (!%p206_p10), [#allocation2], %s503_s9  ;;  %s509_s12 = sshll.u32 (!%p206_p10), %s643_s18, 5 }
  0x11   : > { %s362_s11 = sshll.u32 (!%p206_p10), %s247_s10, 4  ;;  %s767_s21 = scalar_lea.hbm (!%p206_p10), %s833_s4, %s509_s12  ;;  %s762_s11 = int_to_ptr.vmem [resolvable:$true] %s362_s11 }
  0x12   : > { %vm332_vm3 = vcmp.eq.s32.totalorder (!%p206_p10), %v314_v30, 0  ;;  %s345_s22 = scalar_lea.sflag (!%p206_p10), [#allocation3], %s245_s8  ;;  %s653_s24 = smov (!%p206_p10), [#allocation2]  }
  0x13   : > { %s577_s26 = sshll.u32 (!%p206_p10), %s653_s24, 4  ;;  %s578_s26 = int_to_ptr.vmem [resolvable:$false] %s577_s26 }
  0x14   : > { %s579_s5 = scalar_lea.vmem (!%p206_p10), %s578_s26, 64  ;;  %p580_p1 = scmp.lt.s32.totalorder (!%p206_p10), %s762_s11, %s578_s26 }
  0x16   : > { %s736_s29 = scalar_select %p248_p11, %s643_s18, 1 }
  0x17   : > { %s573_s18 = scalar_lea.vmem %s762_s11, 32 }
  0x18   : > { %s512_s30 = sshll.u32 %s736_s29, 4  ;;  %p574_p12 = scmp.ne.s32.totalorder %s762_s11, %s573_s18 }
  0x19   : > { %s255_s7 = scalar_lea.vmem %s829_s0, %s512_s30  ;;  %p581_p2 = scmp.lt.s32.totalorder %s579_s5, %s573_s18 }
  0x1a   : > { %v744_v0 = vld [vmem:[%s255_s7] sm:$0xff]  ;;  %v746_v1 = vld [vmem:[%s255_s7 + $0x8] sm:$0xff]  ;;  %p575_p13 = pnand %p574_p12, %p719_p4 }
  0x1b   : > { %v273_v2 = vsel %vm272_vm0, %v744_v0, 0.0  ;;  %v274_v3 = vsel %vm272_vm0, %v746_v1, 0.0  ;;  %p582_p3 = por %p581_p2, %p580_p1 }
  0x1c   : > { %v275_v4 = vadd.f32 %v274_v3, %v273_v2  ;;  %p576_p0 = pneg %p575_p13 }
  0x1e   : > { %v276_v5 = vrot.slane %v275_v4, 4  ;;  %p583_p5 = pnand %p582_p3, %p576_p0 }
  0x20   : > { %v277_v6 = vadd.f32 %v276_v5, %v275_v4 }
  0x22   : > { %v278_v7 = vrot.slane %v277_v6, 2 }
  0x24   : > { %v279_v8 = vadd.f32 %v278_v7, %v277_v6 }
  0x26   : > { %v280_v9 = vrot.slane %v279_v8, 1 }
  0x28   : > { %v281_v10 = vadd.f32 %v280_v9, %v279_v8 }
  0x2a   : > { %v752_v11 = vmul.f32 0.0625, %v281_v10 }
  0x2c   : > { %v284_v12 = vsub.f32 %v744_v0, %v752_v11  ;;  %v285_v13 = vsub.f32 %v746_v1, %v752_v11 }
  0x2e   : > { %v286_v14 = vmul.f32 %v284_v12, %v284_v12  ;;  %v287_v15 = vmul.f32 %v285_v13, %v285_v13 }
  0x30   : > { %v288_v16 = vsel %vm272_vm0, %v286_v14, 0.0  ;;  %v289_v17 = vsel %vm272_vm0, %v287_v15, 0.0 }
  0x31   : > { %v290_v18 = vadd.f32 %v289_v17, %v288_v16 }
  0x33   : > { %v291_v19 = vrot.slane %v290_v18, 4 }
  0x35   : > { %v292_v20 = vadd.f32 %v291_v19, %v290_v18 }
  0x37   : > { %v293_v21 = vrot.slane %v292_v20, 2 }
  0x39   : > { %v294_v22 = vadd.f32 %v293_v21, %v292_v20 }
  0x3b   : > { %v295_v23 = vrot.slane %v294_v22, 1 }
  0x3d   : > { %v296_v24 = vadd.f32 %v295_v23, %v294_v22 }
  0x3f   : > { %v297_v25 = vmul.f32 0.06666667, %v296_v24 }
  0x41   : > { %569 = vrsqrt.f32 %v297_v25  ;;  %vm300_vm1 = vcmp.eq.f32.partialorder %v297_v25, inf  ;;  %v303_v28 = vand.u32 2147483648, %v297_v25  ;;  %vm302_vm2 = vcmp.eq.f32.partialorder %v297_v25, 0.0 }
  0x4b   : > { %v570_v27 = vpop.eup %569 }
  0x4c   : > { %v299_v29 = vmul.f32 %v570_v27, %v297_v25 }
  0x4e   : > { %v301_v31 = vsel %vm300_vm1, %v297_v25, %v299_v29 }
  0x4f   : > { %v304_v32 = vsel %vm302_vm2, %v303_v28, %v301_v31 }
  0x50   : > { %v305_v33 = vadd.f32 1e-05, %v304_v32 }
  0x52   : > { %571 = vrcp.f32 %v305_v33  ;;  %v333_v34 = vsel %vm332_vm3, %v752_v11, %v305_v33 }
  0x53   : > { %335 = vst.msk [vmem:[%s247_s10] sm:$0x3] %vm334_vm4, %v333_v34 }
  0x54   : > { %586 = shalt.err (!%p583_p5)
}
  0x55   : > { %s587_s6 = scalar_lea.hbm %s767_s21, 32  ;;  %s591_s9 = scalar_lea.hbm %s833_s4, 64 }
  0x56   : > { %p588_p6 = scmp.ne.s32.totalorder %s767_s21, %s587_s6  ;;  %p592_p10 = scmp.lt.u32.totalorder %s767_s21, %s833_s4 }
  0x57   : > { %p593_p11 = scmp.lt.u32.totalorder %s591_s9, %s587_s6  ;;  %p595_p13 = scmp.lt.u32.totalorder %s587_s6, %s767_s21 }
  0x58   : > { %p589_p7 = pnand %p588_p6, %p719_p4 }
  0x59   : > { %p594_p12 = por %p593_p11, %p592_p10 }
  0x5a   : > { %p590_p9 = pneg %p589_p7 }
  0x5b   : > { %p596_p0 = por %p595_p13, %p594_p12 }
  0x5d   : > { %p597_p1 = pnand %p596_p0, %p590_p9 }
  0x5f   : > { %600 = shalt.err (!%p597_p1)
}
  0x60   : > { %514 = dma.vmem_to_hbm [thread:$0]  (%p719_p4), %s762_s11, 32, %s767_s21, %s345_s22   ;;  %v306_v35 = vld [vmem:[%s830_s1] sm:$0x1]  ;;  %v315_v36 = vsub.s32 0, %v314_v30  ;;  %v572_v37 = vpop.eup %571 }
  0x61   : > { %v309_v38 = vmul.f32 %v572_v37, %v306_v35  ;;  %v307_v39 = vld [vmem:[%s831_s2] sm:$0x1]  ;;  %s269_s21 = scalar_lea.vmem %s832_s3, %s512_s30 }
  0x63   : > { %v310_v40 = vmul.f32 %v309_v38, %v752_v11  ;;  %v316_v41 = vrot.slane %v309_v38, %v315_v36 }
  0x65   : > { %v311_v42 = vsub.f32 %v307_v39, %v310_v40  ;;  %v318_v43 = vmul.f32 %v316_v41, %v744_v0  ;;  %v319_v44 = vmul.f32 %v316_v41, %v746_v1 }
  0x67   : > { %v324_v45 = vrot.slane %v311_v42, %v315_v36 }
  0x69   : > { %v326_v46 = vadd.f32 %v324_v45, %v318_v43  ;;  %v327_v47 = vadd.f32 %v324_v45, %v319_v44 }
  0x6b   : > { %328 = vst.msk [vmem:[%s269_s21] sm:$0xff] %vm272_vm0, %v326_v46  ;;  %329 = vst.msk [vmem:[%s269_s21 + $0x8] sm:$0xff] %vm272_vm0, %v327_v47 }
  0x6c PF: > { %p520_p4 = scmp.ge.s32.totalorder %s651_s20, 2  ;;  %s385_s22 = sand.u32 1, %s631_s15  }
  0x6d   : > { %s386_s26 = scalar_lea.sflag [#allocation3], %s385_s22 }
  0x6e   : > { %p517_p2 = pnand %p520_p4, %p726_p8 }
  0x70   : > { %626 = dma.done.wait (!%p517_p2), %s386_s26, 32  }
  0x71   : > { %628 = vsyncadd (!%p517_p2), %s386_s26, 4294967264  ;;  %s18_s20 = sadd.s32 1, %s651_s20   ;;  %s836_s15 = smov %s635_s16 }
  0x72   : > { %p15_p3 = scmp.ge.s32.totalorder %s18_s20, 4   ;;  %s837_s16 = smov %s639_s17 }
  0x73   : > { %s838_s17 = smov %s732_s28  ;;  %s839_s18 = smov %s647_s19 }
  0x74   : > { %s840_s19 = smov %s842_s23  ;;  %17 = sbr.rel (!%p15_p3) target bundleno = 4 (0x4), region = 85 }
  0x7b   :  { %391 = vsyncpa [#allocation3], 1 }
  0x7c   :  { %393 = vsyncpa [#allocation3 + $0x1], 1 }

</bundles_post_ra>
